<compile_context>
chip_gen: v7x
topology: tpu7x:2x2x1
jax: 0.10.0
libtpu: 0.0.40
codegen_flags: <defaults>
</compile_context>

<pallas_src>
import functools
import math

import jax
import jax.numpy as jnp
from jax.experimental import pallas as pl
from jax.experimental.pallas import tpu as pltpu


def _pos_enc_add_kernel(inv_freq_ref, phase_ref, x_ref, o_ref, pe_ref, *,
                        fold, pos_start):
    """One (1, TR, LD) block of the lane-dense view.

    Grid is (T, B) with B innermost ("arbitrary"): the PE tile is computed into
    `pe_ref` (VMEM scratch) only at b == 0 and reused for the remaining batch
    entries, so the sin polynomial is paid once per sequence tile, not once per
    (batch, tile).
    """
    _, tr, _ = x_ref.shape
    t = pl.program_id(0)

    @pl.when(pl.program_id(1) == 0)
    def _():
        # Row index in the folded view -> absolute sequence position (1, TR, 1).
        row = jax.lax.broadcasted_iota(jnp.int32, (1, tr, 1), 1) + t * tr
        pos = (row * fold + pos_start).astype(jnp.float32)
        # inv_freq / phase are precomputed lane-constant vectors (1, 1, LD);
        # cos lanes are folded into sin via a +pi/2 phase and the intra-row
        # position offset (fold > 1) is pre-multiplied into the phase, so the
        # per-element cost is exactly mul + add + sin.
        pe_ref[...] = jnp.sin(pos * inv_freq_ref[...] + phase_ref[...])

    o_ref[...] = (x_ref[...].astype(jnp.float32) + pe_ref[...]).astype(o_ref.dtype)


def _vmem_physical_bytes():
    try:
        cap = getattr(pltpu.get_tpu_info(), "vmem_capacity_bytes", None)
        if cap:
            return int(cap)
    except Exception:
        pass
    return 64 << 20          # conservative fallback: v7x per-TC physical VMEM


def positional_encoding_forward(x, *, max_len=5000):
    """x: (B, S, D) array. Returns x + pe[:, -S:, :] (same dtype as x)."""
    B, S, D = x.shape
    assert S <= max_len
    pos_start = max_len - S
    itemsize = x.dtype.itemsize

    # ---- choose a lane-dense view -------------------------------------------
    if D % 128 == 0:
        fold = 1                       # already lane-dense
    elif D < 128 and 128 % D == 0 and (S * D) % 128 == 0:
        fold = 128 // D                # pack `fold` positions into one 128-lane row
    else:
        fold = 1
        # TODO(synk): ragged D (neither divides nor is divided by 128) keeps
        # masked vst on the tail lanes; a wrapper-side pad-to-128 + slice would
        # make it lane-dense.

    LD = D * fold
    rows = S // fold
    x_view = x.reshape(B, rows, LD) if fold > 1 else x

    # ---- lane-constant vectors, hoisted out of the kernel --------------------
    lane = jnp.arange(LD, dtype=jnp.int32)
    if fold > 1:
        d = lane % D                                    # feature index inside d_model
        s_in_row = (lane // D).astype(jnp.float32)      # seq offset packed in this row
    else:
        d = lane
        s_in_row = jnp.zeros((LD,), jnp.float32)
    parity = (d % 2).astype(jnp.float32)                # 0 -> sin lane, 1 -> cos lane
    d_even = (d - (d % 2)).astype(jnp.float32)          # 2 * (d // 2)
    inv_freq = jnp.exp(d_even * jnp.float32(-math.log(10000.0) / D))
    # cos(a) == sin(a + pi/2); fold the intra-row position offset into the phase.
    phase = s_in_row * inv_freq + parity * jnp.float32(math.pi / 2.0)
    inv_freq = inv_freq.reshape(1, 1, LD).astype(jnp.float32)
    phase = phase.reshape(1, 1, LD).astype(jnp.float32)

    # ---- dtype-aware tile size bounded by the per-generation VMEM budget -----
    sub = max(8, 32 // itemsize)                 # packed sublane multiple (f32:8, bf16:16, i8:32)
    phys = _vmem_physical_bytes()
    budget = (phys * 3) // 4 - (4 << 20)         # headroom below physical VMEM
    # Live VMEM per tile row: 2x input + 2x output (double-buffered) + f32 PE scratch.
    bytes_per_row_live = LD * (4 * itemsize + 4)
    rows_budget = max(sub, budget // bytes_per_row_live)
    rows_cap = max(sub, (8 << 20) // (LD * itemsize))   # <= ~8 MiB x-tile: keep pipeline depth
    target_rows = min(rows_budget, rows_cap)
    if rows <= target_rows:
        tile_rows = rows                          # full extent is always legal
    else:
        tile_rows = max(sub, (target_rows // sub) * sub)

    num_t = pl.cdiv(rows, tile_rows)
    grid = (num_t, B)                             # B innermost -> PE reuse across batch

    live_bytes = tile_rows * LD * (4 * itemsize + 4) + 8 * LD * 4 + (2 << 20)
    vmem_limit = int(min((phys * 3) // 4, max(live_bytes, 32 << 20)))

    kernel = functools.partial(_pos_enc_add_kernel, fold=fold, pos_start=pos_start)

    cost = pl.CostEstimate(
        flops=int(2 * B * rows * LD + 2 * rows * LD),
        transcendentals=int(rows * LD),            # PE computed once per tile across batch
        bytes_accessed=int(2 * B * rows * LD * itemsize + 2 * LD * 4),
    )

    out = pl.pallas_call(
        kernel,
        out_shape=jax.ShapeDtypeStruct((B, rows, LD), x.dtype),
        grid_spec=pltpu.PrefetchScalarGridSpec(
            num_scalar_prefetch=0,
            grid=grid,
            in_specs=[
                pl.BlockSpec((1, 1, LD), lambda t, b: (0, 0, 0)),        # inv_freq (const)
                pl.BlockSpec((1, 1, LD), lambda t, b: (0, 0, 0)),        # phase    (const)
                pl.BlockSpec((1, tile_rows, LD), lambda t, b: (b, t, 0)),
            ],
            out_specs=pl.BlockSpec((1, tile_rows, LD), lambda t, b: (b, t, 0)),
            scratch_shapes=[pltpu.VMEM((1, tile_rows, LD), jnp.float32)],
        ),
        compiler_params=pltpu.CompilerParams(
            dimension_semantics=("parallel", "arbitrary"),
            vmem_limit_bytes=vmem_limit,
        ),
        cost_estimate=cost,
    )(inv_freq, phase, x_view)

    return out.reshape(B, S, D) if fold > 1 else out


def _reference(x, *, max_len=5000):
    # Pure-JAX mirror of the PyTorch buffer construction.
    B, S, D = x.shape
    position = jnp.arange(max_len, dtype=jnp.float32)[:, None]
    div_term = jnp.exp(
        jnp.arange(0, D, 2, dtype=jnp.float32) * (-math.log(10000.0) / D)
    )
    pe = jnp.zeros((max_len, D), dtype=jnp.float32)
    pe = pe.at[:, 0::2].set(jnp.sin(position * div_term))
    pe = pe.at[:, 1::2].set(jnp.cos(position * div_term))
    return x.astype(jnp.float32) + pe[None, -S:, :]


if __name__ == "__main__":
    key = jax.random.PRNGKey(0)

    # Test 1: small D -> lane-folding path (D=32 -> fold=4), f32.
    B, S, D = 2, 8, 32
    x = jax.random.normal(key, (B, S, D), dtype=jnp.float32)
    out = jax.block_until_ready(positional_encoding_forward(x, max_len=64))
    ref = _reference(x, max_len=64)
    assert out.shape == (B, S, D)
    assert jnp.allclose(out, ref, atol=1e-4, rtol=1e-5)

    # Test 2: D multiple of 128 -> unfolded (already lane-dense) path, f32.
    x2 = jax.random.normal(jax.random.PRNGKey(1), (2, 16, 128), dtype=jnp.float32)
    out2 = jax.block_until_ready(positional_encoding_forward(x2, max_len=32))
    ref2 = _reference(x2, max_len=32)
    assert out2.shape == (2, 16, 128)
    assert jnp.allclose(out2, ref2, atol=1e-4, rtol=1e-5)

    # Test 3: full max_len=5000 (large positions exercise the cos->sin+pi/2
    # phase trick's f32 range reduction) + batch reuse across B, fold=2.
    x3 = jax.random.normal(jax.random.PRNGKey(2), (2, 256, 64), dtype=jnp.float32)
    out3 = jax.block_until_ready(positional_encoding_forward(x3, max_len=5000))
    ref3 = _reference(x3, max_len=5000)
    assert out3.shape == (2, 256, 64)
    assert jnp.allclose(out3, ref3, atol=2e-3, rtol=1e-5)

    # Test 4: bf16 input exercises the dtype-aware tiling + f32 accumulate path.
    x4 = jax.random.normal(jax.random.PRNGKey(3), (2, 16, 128), dtype=jnp.bfloat16)
    out4 = jax.block_until_ready(positional_encoding_forward(x4, max_len=32))
    ref4 = _reference(x4, max_len=32)
    assert out4.shape == (2, 16, 128) and out4.dtype == jnp.bfloat16
    assert jnp.allclose(out4.astype(jnp.float32), ref4, atol=5e-2)

    print("KERNEL_OK")
</pallas_src>

<mosaic_0001>
module attributes {stable_mosaic.version = 11 : i64} {
  func.func @_pos_enc_add_kernel(%arg0: i32, %arg1: i32, %arg2: memref<1x1x128xf32, #tpu.memory_space<vmem>>, %arg3: memref<1x1x128xf32, #tpu.memory_space<vmem>>, %arg4: memref<1x2x128xf32, #tpu.memory_space<vmem>>, %arg5: memref<1x2x128xf32, #tpu.memory_space<vmem>>, %arg6: memref<1x2x128xf32, #tpu.memory_space<vmem>>) attributes {dimension_semantics = [#tpu.dimension_semantics<parallel>, #tpu.dimension_semantics<arbitrary>], iteration_bounds = array<i64: 1, 2>, scalar_prefetch = 0 : i64, scratch_operands = 1 : i64, tpu.core_type = #tpu.core_type<tc>, window_params = [{pipeline_mode = #tpu.pipeline_mode<synchronous>, transform_indices = @transform_0, window_bounds = array<i64: 1, 1, 128>}, {pipeline_mode = #tpu.pipeline_mode<synchronous>, transform_indices = @transform_1, window_bounds = array<i64: 1, 1, 128>}, {transform_indices = @transform_2, window_bounds = array<i64: 1, 2, 128>}, {transform_indices = @transform_3, window_bounds = array<i64: 1, 2, 128>}]} {
    %c0_i32 = arith.constant 0 : i32
    %0 = arith.cmpi eq, %arg1, %c0_i32 : i32
    %1 = arith.extui %0 : i1 to i32
    %c0_i32_0 = arith.constant 0 : i32
    %2 = arith.cmpi ne, %1, %c0_i32_0 : i32
    scf.if %2 {
      %7 = tpu.iota {dimensions = array<i32: 1>} : vector<1x2x1xi32>
      %c2_i32 = arith.constant 2 : i32
      %8 = arith.muli %arg0, %c2_i32 : i32
      %9 = vector.broadcast %8 : i32 to vector<1x2x1xi32>
      %10 = arith.addi %7, %9 : vector<1x2x1xi32>
      %c4_i32 = arith.constant 4 : i32
      %11 = vector.broadcast %c4_i32 : i32 to vector<1x2x1xi32>
      %12 = arith.muli %10, %11 : vector<1x2x1xi32>
      %c56_i32 = arith.constant 56 : i32
      %13 = vector.broadcast %c56_i32 : i32 to vector<1x2x1xi32>
      %14 = arith.addi %12, %13 : vector<1x2x1xi32>
      %15 = arith.sitofp %14 : vector<1x2x1xi32> to vector<1x2x1xf32>
      %c0_9 = arith.constant 0 : index
      %c0_10 = arith.constant 0 : index
      %c0_11 = arith.constant 0 : index
      %16 = vector.load %arg2[%c0_9, %c0_10, %c0_11] : memref<1x1x128xf32, #tpu.memory_space<vmem>>, vector<1x1x128xf32>
      %17 = vector.broadcast %15 : vector<1x2x1xf32> to vector<1x2x128xf32>
      %18 = vector.broadcast %16 : vector<1x1x128xf32> to vector<1x2x128xf32>
      %19 = arith.mulf %17, %18 : vector<1x2x128xf32>
      %c0_12 = arith.constant 0 : index
      %c0_13 = arith.constant 0 : index
      %c0_14 = arith.constant 0 : index
      %20 = vector.load %arg3[%c0_12, %c0_13, %c0_14] : memref<1x1x128xf32, #tpu.memory_space<vmem>>, vector<1x1x128xf32>
      %21 = vector.broadcast %20 : vector<1x1x128xf32> to vector<1x2x128xf32>
      %22 = arith.addf %19, %21 : vector<1x2x128xf32>
      %23 = math.sin %22 : vector<1x2x128xf32>
      %c0_15 = arith.constant 0 : index
      %c0_16 = arith.constant 0 : index
      %c0_17 = arith.constant 0 : index
      %24 = vector.load %arg6[%c0_15, %c0_16, %c0_17] : memref<1x2x128xf32, #tpu.memory_space<vmem>>, vector<1x2x128xf32>
      tpu.vector_store %arg6[%c0_15, %c0_16, %c0_17], %23 {strides = array<i32>} : memref<1x2x128xf32, #tpu.memory_space<vmem>>, vector<1x2x128xf32>,
    } else {
    }
    %c0 = arith.constant 0 : index
    %c0_1 = arith.constant 0 : index
    %c0_2 = arith.constant 0 : index
    %3 = vector.load %arg4[%c0, %c0_1, %c0_2] : memref<1x2x128xf32, #tpu.memory_space<vmem>>, vector<1x2x128xf32>
    %c0_3 = arith.constant 0 : index
    %c0_4 = arith.constant 0 : index
    %c0_5 = arith.constant 0 : index
    %4 = vector.load %arg6[%c0_3, %c0_4, %c0_5] : memref<1x2x128xf32, #tpu.memory_space<vmem>>, vector<1x2x128xf32>
    %5 = arith.addf %3, %4 : vector<1x2x128xf32>
    %c0_6 = arith.constant 0 : index
    %c0_7 = arith.constant 0 : index
    %c0_8 = arith.constant 0 : index
    %6 = vector.load %arg5[%c0_6, %c0_7, %c0_8] : memref<1x2x128xf32, #tpu.memory_space<vmem>>, vector<1x2x128xf32>
    tpu.vector_store %arg5[%c0_6, %c0_7, %c0_8], %5 {strides = array<i32>} : memref<1x2x128xf32, #tpu.memory_space<vmem>>, vector<1x2x128xf32>,
    return
  }
  func.func @transform_0(%arg0: i32, %arg1: i32) -> (i32, i32, i32) {
    %c0_i32 = arith.constant 0 : i32
    %c0_i32_0 = arith.constant 0 : i32
    %c0_i32_1 = arith.constant 0 : i32
    %c0_i32_2 = arith.constant 0 : i32
    return %c0_i32, %c0_i32_0, %c0_i32_1 : i32, i32, i32
  }
  func.func @transform_1(%arg0: i32, %arg1: i32) -> (i32, i32, i32) {
    %c0_i32 = arith.constant 0 : i32
    %c0_i32_0 = arith.constant 0 : i32
    %c0_i32_1 = arith.constant 0 : i32
    %c0_i32_2 = arith.constant 0 : i32
    return %c0_i32, %c0_i32_0, %c0_i32_1 : i32, i32, i32
  }
  func.func @transform_2(%arg0: i32, %arg1: i32) -> (i32, i32, i32) {
    %c0_i32 = arith.constant 0 : i32
    %c0_i32_0 = arith.constant 0 : i32
    return %arg1, %arg0, %c0_i32 : i32, i32, i32
  }
  func.func @transform_3(%arg0: i32, %arg1: i32) -> (i32, i32, i32) {
    %c0_i32 = arith.constant 0 : i32
    %c0_i32_0 = arith.constant 0 : i32
    return %arg1, %arg0, %c0_i32 : i32, i32, i32
  }
}

</mosaic_0001>

<bundles_post_ra>
// kernel: tpu_custom_call.1
= control target key start
LH: loop header
LB: loop body
LE: loop exit
PB: predicated region body
PF: predicated region fallthrough
CT: control target
= control target key end

     0   :  { %8 = vsyncpa [#allocation4], 0  ;;  %s868_s0 = inlined_call_operand.hbm [shape: f32[1,1,128], index: 0, kind: input, shape index: {}]   ;;  %s869_s1 = inlined_call_operand.vmem [shape: f32[1,1,128], index: 1, kind: input, shape index: {}]   ;;  %s870_s2 = inlined_call_operand.vmem [shape: f32[2,2,128], index: 2, kind: input, shape index: {}]   ;;  %s871_s3 = inlined_call_operand.hbm [shape: f32[2,2,128], index: 3, kind: output, shape index: {}]  }
   0x1   :  { %9 = vsyncpa [#allocation5], 0 }
   0x2   :  { %11 = vsyncpa [#allocation5 + $0x1], 0  ;;  %s679_s12 = smov 0   ;;  %s681_s13 = smov 0  }
   0x3   :  { %s683_s14 = smov 0   ;;  %s685_s15 = smov 0  }
   0x4   :  { %s687_s16 = smov 0   ;;  %s689_s17 = smov 0  }
   0x5 LB: > { %s439_s18 = sadd.s32 4294967295, %s649_s17   ;;  %s440_s19 = sadd.s32 4294967294, %s649_s17   ;;  %s649_s17 = sphi %s689_s17, %s17_s17   ;;  %s645_s16 = sphi %s687_s16, %s889_s16   ;;  %s641_s15 = sphi %s685_s15, %s888_s15   ;;  %s637_s14 = sphi %s683_s14, %s887_s14   ;;  %s633_s13 = sphi %s681_s13, %s886_s13   ;;  %s629_s12 = sphi %s679_s12, %s885_s12  }
   0x6   : > { %s26_s20 = sadd.s32 1, %s645_s16  ;;  %s108_s21 = sadd.s32 1, %s637_s14 }
   0x7   : > { %p27_p0 = scmp.ge.s32.totalorder %s26_s20, 2  ;;  %p118_p1 = scmp.ne.s32.totalorder %s637_s14, %s633_s13 }
   0x8   : > { %p119_p2 = scmp.eq.s32.totalorder %s439_s18, 1  ;;  %p124_p3 = scmp.ne.s32.totalorder %s633_s13, %s629_s12 }
   0x9   : > { %s891_s20 = smov (%p27_p0, %s26_s20), 0  ;;  %p125_p5 = scmp.eq.s32.totalorder %s440_s19, 1 }
   0xa   : > { %p719_p4 = por %p119_p2, %p118_p1  ;;  %s103_s23 = ssub.s32 %s645_s16, %s891_s20 }
   0xb   : > { %p441_p6 = scmp.ge.s32.totalorder %s649_s17, 1  ;;  %p106_p7 = scmp.eq.s32.totalorder %s103_s23, 0 }
   0xc   : > { %s876_s22 = scalar_select %p719_p4, 1, 0 }
   0xd   : > { %p726_p8 = por %p125_p5, %p124_p3  ;;  %p132_p9 = scmp.lt.s32.totalorder %s649_s17, 3 }
   0xe   : > { %s732_s25 = scalar_select %p106_p7, %s637_s14, %s108_s21  }
   0xf   : > { %s877_s24 = scalar_select %p726_p8, 1, 0 }
  0x10   : > { %p734_p10 = pnand %p441_p6, %p132_p9  ;;  %p738_p11 = scmp.eq.s32.totalorder %s439_s18, 0 }
  0x11   : > { %s651_s28 = smov [#allocation3]   ;;  %s539_s6 = scalar_lea.hbm %s868_s0, 16 }
  0x12   : > { %s878_s26 = scalar_select %p734_p10, 1, 0 }
  0x13   : > { %s879_s27 = scalar_select %p738_p11, 1, 0 }
  0x14   : > { %p469_p12 = pneg %p734_p10  ;;  %s145_s29 = sshll.u32 %s651_s28, 4  ;;  %s146_s29 = int_to_ptr.vmem [resolvable:$true] %s145_s29 }
  0x15   : > { %p540_p0 = scmp.ne.s32.totalorder %s868_s0, %s539_s6  ;;  %p546_p5 = scmp.lt.u32.totalorder %s539_s6, %s868_s0 }
  0x16   : > { %p746_p13 = pnand %p738_p11, %p469_p12 }
  0x18   : > { %p541_p1 = pneg %p746_p13 }
  0x1a   : > { %p542_p2 = pnand %p541_p1, %p540_p0 }
  0x1c   : > { %p543_p3 = pneg %p542_p2 }
  0x1e   : > { %p548_p6 = pnand %p546_p5, %p543_p3 }
  0x20   : > { %551 = shalt.err (!%p548_p6)
}
  0x21   : > { %s552_s11 = scalar_lea.vmem %s146_s29, 16  ;;  %s559_s18 = scalar_lea.vmem %s146_s29, 32 }
  0x22   : > { %p553_p7 = scmp.ne.s32.totalorder %s146_s29, %s552_s11  ;;  %p560_p8 = scmp.lt.s32.totalorder %s146_s29, %s146_s29 }
  0x23   : > { %p561_p4 = scmp.lt.s32.totalorder %s559_s18, %s552_s11 }
  0x24   : > { %p555_p9 = pnand %p553_p7, %p541_p1 }
  0x25   : > { %p562_p11 = por %p561_p4, %p560_p8 }
  0x26   : > { %p556_p12 = pneg %p555_p9 }
  0x28   : > { %p563_p10 = pnand %p562_p11, %p556_p12 }
  0x2a   : > { %566 = shalt.err (!%p563_p10)
}
  0x2b   : > { %472 = dma.hbm_to_vmem [thread:$0]  (!%p746_p13), %s868_s0, 16, %s146_s29, [#allocation4]  }
  0x2c   : > { %p881_p0 = scmp.ne.s32.totalorder %s878_s26, 0 }
  0x2d   : > { %p882_p2 = scmp.ne.s32.totalorder (!%p881_p0), %s879_s27, 0 }
  0x2e   : > { %171 = sbr.rel (%p881_p0) target bundleno = 177 (0xb1), region = 32 }
  0x35   : > { %620 = dma.done.wait (%p882_p2), [#allocation4], 16  }
  0x36   : > { %622 = vsyncadd (%p882_p2), [#allocation4], 4294967280  ;;  %s194_s23 = sand.u32 1, %s633_s13   ;;  %p197_p4 = scmp.lt.s32.totalorder %s641_s15, 1 }
  0x37   : > { %s776_s28 = sshll.u32 %s194_s23, 1  ;;  %p448_p8 = scmp.ne.s32.totalorder %s641_s15, 0 }
  0x38   : > { %s198_s29 = scalar_select %p197_p4, %s641_s15, 1 }
  0x39   : > { %s196_s6 = scalar_lea.vmem [#allocation6], %s776_s28  ;;  %207 = sbr.rel (%p448_p8) target bundleno = 152 (0x98), region = 40  ;;  %v208_v0 = vlaneseq (!%p448_p8)  ;;  %v449_v4 = vld [vmem:[#allocation3] ss:$0 sm:$0xff] (!%p448_p8)  ;;  %v450_v6 = vld [vmem:[%s869_s1] ss:$0 sm:$0xff] (!%p448_p8) }
  0x3a   : > { %s447_s30 = sshll.u32 %s198_s29, 1  ;;  %v652_v20 = vmov (!%p448_p8), 683565275   ;;  %v653_v22 = vmov (!%p448_p8), 2475754826  }
  0x3b   : > { %s782_s5 = scalar_lea.vmem %s870_s2, %s447_s30  ;;  %v209_v1 = vshrl.u32 (!%p448_p8), %v208_v0, 7  ;;  %v654_v24 = vmov (!%p448_p8), 2131351028   ;;  %v655_v26 = vmov (!%p448_p8), 2102212464  }
  0x3c   : > { %v656_v28 = vmov (!%p448_p8), 920167782   ;;  %v657_v35 = vmov (!%p448_p8), 1326507024  }
  0x3d   : > { %v213_v2 = vmul.u32 (!%p448_p8), 4, %v209_v1 }
  0x3f   : > { %v214_v3 = vadd.s32 (!%p448_p8), 56, %v213_v2 }
  0x41   : > { %v215_v5 = vcvt.s32.f32 %v214_v3 }
  0x43   : > { %v223_v7 = vmul.f32 %v449_v4, %v215_v5 }
  0x45   : > { %v789_v8 = vadd.f32 %v450_v6, %v223_v7 }
  0x47   : > { %v235_v9 = vand.u32 2139095040, %v789_v8  ;;  %v232_v11 = vand.u32 2147483647, %v789_v8  ;;  %vm234_vm7 = vcmp.lt.s32.totalorder %v789_v8, 0  ;;  %vm324_vm12 = vweird.f32 %v789_v8 }
  0x49   : > { %v236_v10 = vshrl.u32 %v235_v9, 23  ;;  %v239_v14 = vand.u32 8388607, %v232_v11  ;;  %vm233_vm8 = vcmp.le.f32.partialorder %v232_v11, 0.7853982 }
  0x4b   : > { %v451_v12 = vadd.s32 4294967169, %v236_v10  ;;  %v240_v17 = vor.u32 8388608, %v239_v14 }
  0x4d   : > { %v242_v13 = vadd.s32 1, %v451_v12  ;;  %v280_v37 = vshll.u32 %v240_v17, 8 }
  0x4f   : > { %vm243_vm0 = vcmp.gt.s32.totalorder %v242_v13, 0 }
  0x50   : > { %v244_v15 = vsel %vm243_vm0, %v242_v13, 0 }
  0x51   : > { %v246_v16 = vand.u32 31, %v244_v15  ;;  %v245_v18 = vshrl.u32 %v244_v15, 5 }
  0x53   : > { %v247_v19 = vsub.s32 32, %v246_v16  ;;  %v249_v21 = vshll.u32 %v652_v20, %v246_v16  ;;  %v252_v23 = vshll.u32 %v653_v22, %v246_v16  ;;  %v255_v25 = vshll.u32 %v654_v24, %v246_v16 }
  0x54   : > { %v258_v27 = vshll.u32 %v655_v26, %v246_v16  ;;  %v261_v29 = vshll.u32 %v656_v28, %v246_v16  ;;  %vm264_vm1 = vcmp.lt.s32.totalorder %v245_v18, 1  ;;  %vm267_vm2 = vcmp.lt.s32.totalorder %v245_v18, 4 }
  0x55   : > { %v248_v30 = vshrl.u32 %v652_v20, %v247_v19  ;;  %v250_v31 = vshrl.u32 %v653_v22, %v247_v19  ;;  %v253_v32 = vshrl.u32 %v654_v24, %v247_v19  ;;  %v256_v33 = vshrl.u32 %v655_v26, %v247_v19 }
  0x56   : > { %v259_v34 = vshrl.u32 %v656_v28, %v247_v19  ;;  %v262_v36 = vshrl.u32 %v657_v35, %v247_v19  ;;  %vm265_vm3 = vcmp.lt.s32.totalorder %v245_v18, 2  ;;  %vm266_vm4 = vcmp.lt.s32.totalorder %v245_v18, 3 }
  0x57   : > { %v251_v38 = vor.u32 %v250_v31, %v249_v21  ;;  %v254_v39 = vor.u32 %v253_v32, %v252_v23  ;;  %v257_v40 = vor.u32 %v256_v33, %v255_v25 }
  0x58   : > { %v260_v41 = vor.u32 %v259_v34, %v258_v27  ;;  %v263_v42 = vor.u32 %v262_v36, %v261_v29 }
  0x59   : > { %v268_v43 = vsel %vm264_vm1, %v248_v30, %v251_v38  ;;  %v269_v44 = vsel %vm267_vm2, %v257_v40, 2102212464  ;;  %v272_v45 = vsel %vm264_vm1, %v251_v38, %v254_v39  ;;  %v276_v46 = vsel %vm264_vm1, %v254_v39, %v257_v40 }
  0x5a   : > { %v270_v47 = vsel %vm266_vm4, %v254_v39, %v269_v44  ;;  %v273_v48 = vsel %vm267_vm2, %v260_v41, 920167782  ;;  %v277_v49 = vsel %vm267_vm2, %v263_v42, 1326507024 }
  0x5b   : > { %v274_v50 = vsel %vm266_vm4, %v257_v40, %v273_v48  ;;  %v278_v51 = vsel %vm266_vm4, %v260_v41, %v277_v49  ;;  %v271_v52 = vsel %vm265_vm3, %v268_v43, %v270_v47 }
  0x5c   : > { %v275_v53 = vsel %vm265_vm3, %v272_v45, %v274_v50  ;;  %v279_v54 = vsel %vm265_vm3, %v276_v46, %v278_v51  ;;  %v287_v59 = vmul.u32 %v280_v37, %v271_v52 }
  0x5d   : > { %v795_v55 = vmul.u32.u64.low %v280_v37, %v279_v54  ;;  %v796_v56 = vmul.u32.u64.high %v280_v37, %v279_v54, %v795_v55  ;;  %v798_v57 = vmul.u32.u64.low %v280_v37, %v275_v53  ;;  %v799_v58 = vmul.u32.u64.high %v280_v37, %v275_v53, %v798_v57 }
  0x5f   : > { %vm289_vm5 = vc.u32 %v796_v56, %v798_v57  ;;  %v290_v60 = vadd.s32 1, %v799_v58  ;;  %v288_v7 = vadd.s32 %v798_v57, %v796_v56 }
  0x61   : > { %v291_v61 = vsel %vm289_vm5, %v290_v60, %v799_v58 }
  0x62   : > { %v292_v62 = vadd.s32 %v291_v61, %v287_v59 }
  0x64   : > { %v293_v63 = vadd.s32 536870912, %v292_v62 }
  0x66   : > { %v294_v0 = vshrl.u32 %v293_v63, 30 }
  0x68   : > { %v295_v1 = vshll.u32 %v294_v0, 30  ;;  %v318_v21 = vsub.s32 4, %v294_v0 }
  0x6a   : > { %v296_v2 = vsub.s32 %v292_v62, %v295_v1  ;;  %v319_v24 = vsel %vm234_vm7, %v318_v21, %v294_v0 }
  0x6b   : > { %v321_v27 = vsel %vm233_vm8, 0, %v319_v24 }
  0x6c   : > { %v298_v3 = vsub.s32 0, %v296_v2  ;;  %v325_v28 = vadd.s32 3, %v321_v27 }
  0x6e   : > { %v452_v4 = vmin.u32 %v298_v3, %v296_v2  ;;  %v326_v29 = vand.u32 3, %v325_v28 }
  0x70   : > { %v300_v5 = vclz %v452_v4  ;;  %vm331_vm9 = vcmp.eq.s32.totalorder %v326_v29, 2  ;;  %vm328_vm10 = vcmp.eq.s32.totalorder %v326_v29, 0  ;;  %vm327_vm11 = vcmp.lt.s32.totalorder %v326_v29, 2 }
  0x72   : > { %v453_v6 = vadd.s32 4294967294, %v300_v5 }
  0x74   : > { %vm454_vm6 = vcmp.lt.s32.totalorder %v453_v6, 0 }
  0x75   : > { %v303_v9 = vsel %vm454_vm6, 0, %v453_v6 }
  0x76   : > { %v304_v10 = vsub.s32 32, %v303_v9  ;;  %v305_v12 = vshll.u32 %v296_v2, %v303_v9  ;;  %v308_v13 = vsub.s32 4294967266, %v303_v9 }
  0x78   : > { %v306_v14 = vshrl.u32 %v288_v7, %v304_v10  ;;  %v309_v15 = vadd.s32 127, %v308_v13 }
  0x7a   : > { %v307_v16 = vor.u32 %v306_v14, %v305_v12  ;;  %v310_v17 = vshll.u32 %v309_v15, 23 }
  0x7c   : > { %v311_v18 = vor.u32 4788187, %v310_v17  ;;  %v314_v19 = vcvt.s32.f32 %v307_v16 }
  0x7e   : > { %v312_v20 = vand.u32 2147483647, %v311_v18 }
  0x80   : > { %v315_v22 = vmul.f32 %v314_v19, %v312_v20 }
  0x82   : > { %v316_v23 = vxor.u32 2147483648, %v315_v22 }
  0x84   : > { %v317_v25 = vsel %vm234_vm7, %v316_v23, %v315_v22 }
  0x85   : > { %v320_v26 = vsel %vm233_vm8, %v789_v8, %v317_v25 }
  0x86   : > { %535 = vcosq.f32 %v320_v26 }
  0x87   : > { %537 = vsinq.f32 %v320_v26 }
  0x90   : > { %v536_v30 = vpop.eup %535 }
  0x91   : > { %v538_v31 = vpop.eup %537  ;;  %v332_v32 = vxor.u32 2147483648, %v536_v30 }
  0x92   : > { %v329_v33 = vxor.u32 2147483648, %v538_v31 }
  0x93   : > { %v333_v11 = vsel %vm331_vm9, %v332_v32, %v538_v31 }
  0x94   : > { %v330_v34 = vsel %vm328_vm10, %v536_v30, %v329_v33 }
  0x95   : > { %v334_v35 = vsel %vm327_vm11, %v330_v34, %v333_v11 }
  0x96   : > { %v335_v36 = vsel %vm324_vm12, nan, %v334_v35 }
  0x97   : > { %336 = vst [vmem:[#allocation2] sm:$0x3] %v335_v36 }
  0x98 PF: > { %v337_v37 = vld [vmem:[%s782_s5] sm:$0x3]  ;;  %s456_s8 = sshll.u32 %s641_s15, 5  ;;  %s356_s18 = sshll.u32 %s196_s6, 4  ;;  %s819_s18 = int_to_ptr.vmem [resolvable:$true] %s356_s18 }
  0x99   : > { %s815_s11 = scalar_lea.hbm %s871_s3, %s456_s8  ;;  %s342_s19 = scalar_lea.sflag [#allocation5], %s194_s23 }
  0x9a   : > { %s567_s21 = scalar_lea.vmem %s819_s18, 32  ;;  %p883_p11 = scmp.ne.s32.totalorder %s876_s22, 0 }
  0x9b   : > { %p568_p10 = scmp.ne.s32.totalorder %s819_s18, %s567_s21  ;;  %s658_s15 = smov [#allocation6]  }
  0x9c   : > { %s571_s29 = sshll.u32 %s658_s15, 4  ;;  %s572_s29 = int_to_ptr.vmem [resolvable:$false] %s571_s29 }
  0x9d   : > { %p569_p13 = pnand %p568_p10, %p883_p11  ;;  %s573_s30 = scalar_lea.vmem %s572_s29, 64 }
  0x9e   : > { %v338_v38 = vld [vmem:[#allocation2] sm:$0x3]  ;;  %p574_p3 = scmp.lt.s32.totalorder %s819_s18, %s572_s29  ;;  %p575_p5 = scmp.lt.s32.totalorder %s573_s30, %s567_s21 }
  0x9f   : > { %v339_v39 = vadd.f32 %v338_v38, %v337_v37  ;;  %p570_p1 = pneg %p569_p13 }
  0xa0   : > { %p576_p6 = por %p575_p5, %p574_p3 }
  0xa1   : > { %340 = vst [vmem:[%s196_s6] sm:$0x3] %v339_v39 }
  0xa2   : > { %p577_p7 = pnand %p576_p6, %p570_p1 }
  0xa4   : > { %580 = shalt.err (!%p577_p7)
}
  0xa5   : > { %s581_s23 = scalar_lea.hbm %s815_s11, 32  ;;  %s585_s4 = scalar_lea.hbm %s871_s3, 64 }
  0xa6   : > { %p582_p9 = scmp.ne.s32.totalorder %s815_s11, %s581_s23  ;;  %p586_p2 = scmp.lt.u32.totalorder %s815_s11, %s871_s3 }
  0xa7   : > { %p587_p4 = scmp.lt.u32.totalorder %s585_s4, %s581_s23  ;;  %p589_p10 = scmp.lt.u32.totalorder %s581_s23, %s815_s11 }
  0xa8   : > { %p583_p12 = pnand %p582_p9, %p883_p11 }
  0xa9   : > { %p588_p8 = por %p587_p4, %p586_p2 }
  0xaa   : > { %p584_p0 = pneg %p583_p12 }
  0xab   : > { %p590_p13 = por %p589_p10, %p588_p8 }
  0xad   : > { %p591_p1 = pnand %p590_p13, %p584_p0 }
  0xaf   : > { %594 = shalt.err (!%p591_p1)
}
  0xb0   : > { %467 = dma.vmem_to_hbm [thread:$0]  (%p883_p11), %s819_s18, 32, %s815_s11, %s342_s19  }
  0xb1 PF: > { %p479_p3 = scmp.ge.s32.totalorder %s649_s17, 2  ;;  %s368_s27 = sand.u32 1, %s629_s12  }
  0xb2   : > { %p884_p5 = scmp.ne.s32.totalorder %s877_s24, 0  ;;  %s369_s7 = scalar_lea.sflag [#allocation5], %s368_s27 }
  0xb4   : > { %p474_p6 = pnand %p479_p3, %p884_p5 }
  0xb6   : > { %624 = dma.done.wait (!%p474_p6), %s369_s7, 32  }
  0xb7   : > { %626 = vsyncadd (!%p474_p6), %s369_s7, 4294967264  ;;  %s17_s17 = sadd.s32 1, %s649_s17   ;;  %s885_s12 = smov %s633_s13 }
  0xb8   : > { %p14_p7 = scmp.ge.s32.totalorder %s17_s17, 4   ;;  %s886_s13 = smov %s637_s14 }
  0xb9   : > { %s887_s14 = smov %s732_s25  ;;  %s888_s15 = smov %s645_s16 }
  0xba   : > { %s889_s16 = smov %s891_s20  ;;  %16 = sbr.rel (!%p14_p7) target bundleno = 5 (0x5), region = 76 }
  0xc1   :  { %374 = vsyncpa [#allocation4], 1 }
  0xc2   :  { %376 = vsyncpa [#allocation4 + $0x1], 1 }
  0xc3   :  { %377 = vsyncpa [#allocation5], 1 }
  0xc4   :  { %379 = vsyncpa [#allocation5 + $0x1], 1 }

</bundles_post_ra>
